<compile_context>
chip_gen: v7x
topology: tpu7x:2x2x1
jax: 0.10.0
libtpu: 0.0.40
codegen_flags: <defaults>
</compile_context>

<pallas_src>
import math

import jax
import jax.numpy as jnp
from jax.experimental import pallas as pl
from jax.experimental.pallas import tpu as pltpu


# ---------------------------------------------------------------------------
# Kernel bodies
# ---------------------------------------------------------------------------
def _dense_matmul_kernel(a_ref, b_ref, bias_ref, o_ref):
    # out_tile = a_tile @ B + bias     (B fully resident; single K block)
    acc = jnp.dot(a_ref[...], b_ref[...], preferred_element_type=jnp.float32)
    o_ref[...] = (acc + bias_ref[...]).astype(o_ref.dtype)


def _aggregate_kernel(adj_ref, s_ref, bias_ref, o_ref, acc_ref):
    # out_tile = sum_k adj[m_tile, k_tile] @ S[k_tile, :]  (+ bias at the end)
    k = pl.program_id(1)

    @pl.when(k == 0)
    def _():
        acc_ref[...] = jnp.zeros_like(acc_ref)

    acc_ref[...] += jnp.dot(
        adj_ref[...], s_ref[...], preferred_element_type=jnp.float32
    )

    @pl.when(k == pl.num_programs(1) - 1)
    def _():
        o_ref[...] = (acc_ref[...] + bias_ref[...]).astype(o_ref.dtype)


# ---------------------------------------------------------------------------
# pallas_call wrappers
# ---------------------------------------------------------------------------
def _dense_matmul(a, b, bias2d, out_dtype, *, tile_m, vmem_limit):
    """Row-tiled small matmul: (M, K) @ (K, F) + bias -> (M, F)."""
    m, k = a.shape
    _, f = b.shape
    tile_m = min(tile_m, m)
    grid = (pl.cdiv(m, tile_m),)

    cost = pl.CostEstimate(
        flops=2 * m * k * f + m * f,
        transcendentals=0,
        bytes_accessed=int(
            a.size * a.dtype.itemsize
            + b.size * b.dtype.itemsize
            + bias2d.size * 4
            + m * f * jnp.dtype(out_dtype).itemsize
        ),
    )

    return pl.pallas_call(
        _dense_matmul_kernel,
        out_shape=jax.ShapeDtypeStruct((m, f), out_dtype),
        grid_spec=pltpu.PrefetchScalarGridSpec(
            num_scalar_prefetch=0,
            grid=grid,
            in_specs=[
                pl.BlockSpec((tile_m, k), lambda i: (i, 0)),  # row tile of A
                pl.BlockSpec((k, f), lambda i: (0, 0)),       # resident B
                pl.BlockSpec((1, f), lambda i: (0, 0)),        # bias row
            ],
            out_specs=pl.BlockSpec((tile_m, f), lambda i: (i, 0)),
        ),
        compiler_params=pltpu.CompilerParams(
            dimension_semantics=("parallel",),
            vmem_limit_bytes=vmem_limit,
        ),
        cost_estimate=cost,
    )(a, b, bias2d)


def _aggregate(adj_p, s_p, bias2d, out_dtype, *, tile_m, tile_k, vmem_limit):
    """(N, Npad) @ (Npad, F) + bias -> (N, F), M x K tiled with f32 accumulator."""
    n, n_pad = adj_p.shape
    _, f = s_p.shape
    num_m = pl.cdiv(n, tile_m)
    num_k = n_pad // tile_k

    cost = pl.CostEstimate(
        flops=2 * n * n_pad * f + n * f,
        transcendentals=0,
        bytes_accessed=int(
            adj_p.size * adj_p.dtype.itemsize
            + s_p.size * s_p.dtype.itemsize
            + bias2d.size * 4
            + n * f * jnp.dtype(out_dtype).itemsize
        ),
    )

    return pl.pallas_call(
        _aggregate_kernel,
        out_shape=jax.ShapeDtypeStruct((n, f), out_dtype),
        grid_spec=pltpu.PrefetchScalarGridSpec(
            num_scalar_prefetch=0,
            grid=(num_m, num_k),
            in_specs=[
                pl.BlockSpec((tile_m, tile_k), lambda i, k: (i, k)),  # adj tile
                pl.BlockSpec((tile_k, f), lambda i, k: (k, 0)),       # S tile
                pl.BlockSpec((1, f), lambda i, k: (0, 0)),            # bias row
            ],
            out_specs=pl.BlockSpec((tile_m, f), lambda i, k: (i, 0)),
            scratch_shapes=[pltpu.VMEM((tile_m, f), jnp.float32)],
        ),
        compiler_params=pltpu.CompilerParams(
            # Reduction (K) axis last and "arbitrary"; row tiles shard across
            # TensorCores on megacore parts.
            dimension_semantics=("parallel", "arbitrary"),
            vmem_limit_bytes=vmem_limit,
        ),
        cost_estimate=cost,
    )(adj_p, s_p, bias2d)


# ---------------------------------------------------------------------------
# Tile / VMEM sizing per TPU generation
# ---------------------------------------------------------------------------
def _vmem_config():
    try:
        cap = int(pltpu.get_tpu_info().vmem_capacity_bytes)
    except Exception:  # unknown / emulated target -> conservative v7x budget
        cap = 64 * 1024 * 1024
    if cap >= 96 * 1024 * 1024:
        # v5e / v6e: 128 MiB physical VMEM -> big tiles, ~100 MiB scoped limit.
        return 100 * 1024 * 1024, 512
    # v7x: 64 MiB per TensorCore -> leave headroom for compiler scratch.
    return 52 * 1024 * 1024, 256


def _aggregate_tiles(n, f_stream, stream_itemsize, budget_bytes, tile_m_pref):
    """Pick (tile_m, tile_k, n_pad) so double-buffered tiles fit the budget."""
    tile_m = min(tile_m_pref, n)

    def working_set(tm, tk):
        adj_b = 2 * tm * tk * stream_itemsize          # adj tile, double-buffered
        s_b = 2 * tk * f_stream * stream_itemsize       # S tile, double-buffered
        out_b = 2 * tm * f_stream * 4                   # output tile (<= f32)
        acc_b = tm * f_stream * 4                       # accumulator scratch
        return adj_b + s_b + out_b + acc_b

    # Full contraction resident (single K block) if it fits.
    if working_set(tile_m, n) <= budget_bytes:
        return tile_m, n, n

    # Otherwise K-tile; largest power-of-two multiple of 512 lanes that fits.
    tile_k = 512
    while tile_k * 2 < n and working_set(tile_m, tile_k * 2) <= budget_bytes:
        tile_k *= 2
    n_pad = ((n + tile_k - 1) // tile_k) * tile_k
    return tile_m, tile_k, n_pad


# ---------------------------------------------------------------------------
# Public entry point: SimpleGraphConvolution.forward
# ---------------------------------------------------------------------------
def simple_graph_convolution(x, adj, weight, bias=None, *,
                             compute_dtype=jnp.bfloat16):
    """Pallas TPU implementation of SimpleGraphConvolution.forward.

    x      : (N, in_features)   float32
    adj    : (N, N)             float32 dense (e.g. row-normalized adjacency)
    weight : (in_features, out_features)
    bias   : (out_features,) or None
    compute_dtype : streaming dtype for the matmuls (bf16 default, f32 exact).
    """
    n, f_in = x.shape
    f_out = weight.shape[1]
    assert adj.shape == (n, n)
    assert weight.shape[0] == f_in

    vmem_limit, tile_m_pref = _vmem_config()
    sizing_budget = int(vmem_limit * 0.8)

    cd = jnp.dtype(compute_dtype)
    x_c = x.astype(cd)
    w_c = weight.astype(cd)
    adj_c = adj.astype(cd)

    b2d = (bias if bias is not None else jnp.zeros((f_out,), jnp.float32))
    b2d = b2d.astype(jnp.float32).reshape(1, f_out)

    # Association choice: stream adj against the thinner of {support, x}.
    transform_first = f_out <= f_in
    f_stream = f_out if transform_first else f_in

    tile_m, tile_k, n_pad = _aggregate_tiles(
        n, f_stream, cd.itemsize, sizing_budget, tile_m_pref
    )
    if n_pad != n:
        # Zero-pad the contraction dim so partial K tiles stay exact.
        adj_c = jnp.pad(adj_c, ((0, 0), (0, n_pad - n)))

    if transform_first:
        # support = x @ W (thin, one small kernel), then out = adj @ support + b
        support = _dense_matmul(
            x_c, w_c, jnp.zeros((1, f_out), jnp.float32), cd,
            tile_m=tile_m_pref, vmem_limit=vmem_limit,
        )
        if n_pad != n:
            support = jnp.pad(support, ((0, n_pad - n), (0, 0)))
        return _aggregate(
            adj_c, support, b2d, jnp.float32,
            tile_m=tile_m, tile_k=tile_k, vmem_limit=vmem_limit,
        )
    else:
        # agg = adj @ x (thin stream), then out = agg @ W + b
        x_s = x_c if n_pad == n else jnp.pad(x_c, ((0, n_pad - n), (0, 0)))
        agg = _aggregate(
            adj_c, x_s, jnp.zeros((1, f_in), jnp.float32), cd,
            tile_m=tile_m, tile_k=tile_k, vmem_limit=vmem_limit,
        )
        return _dense_matmul(
            agg, w_c, b2d, jnp.float32,
            tile_m=tile_m_pref, vmem_limit=vmem_limit,
        )


# ---------------------------------------------------------------------------
# Deterministic example run + checks
# ---------------------------------------------------------------------------
if __name__ == "__main__":
    base_key = jax.random.PRNGKey(0)

    def make_inputs(n, f_in, f_out, tag):
        kx, kadj, kw, kb = jax.random.split(jax.random.fold_in(base_key, tag), 4)
        x = jax.random.normal(kx, (n, f_in), dtype=jnp.float32)
        a = (jax.random.uniform(kadj, (n, n)) < 0.05).astype(jnp.float32)
        a = a + jnp.eye(n, dtype=jnp.float32)
        adj = a / jnp.sum(a, axis=1, keepdims=True)   # row-normalized + self loops
        stdv = 1.0 / math.sqrt(f_out)                 # matches reset_parameters()
        w = jax.random.uniform(kw, (f_in, f_out), minval=-stdv, maxval=stdv,
                               dtype=jnp.float32)
        b = jax.random.uniform(kb, (f_out,), minval=-stdv, maxval=stdv,
                               dtype=jnp.float32)
        return x, adj, w, b

    def ref_bf16(x, adj, w, b, transform_first):
        bf = jnp.bfloat16
        if transform_first:
            s = jnp.dot(x.astype(bf), w.astype(bf),
                        preferred_element_type=jnp.float32).astype(bf)
            out = jnp.dot(adj.astype(bf), s, preferred_element_type=jnp.float32)
        else:
            agg = jnp.dot(adj.astype(bf), x.astype(bf),
                          preferred_element_type=jnp.float32).astype(bf)
            out = jnp.dot(agg, w.astype(bf), preferred_element_type=jnp.float32)
        return out + b[None, :]

    # Case 1: F_out <= F_in (transform-first path); N=640 exercises partial
    # trailing row tiles for both tile_m=512 (v5e/v6e) and tile_m=256 (v7x).
    x, adj, w, b = make_inputs(640, 256, 128, tag=1)
    out = jax.block_until_ready(simple_graph_convolution(x, adj, w, b))
    ref = ref_bf16(x, adj, w, b, transform_first=True)
    assert out.shape == (640, 128)
    assert jnp.allclose(out, ref, rtol=2e-3, atol=2e-3), \
        float(jnp.max(jnp.abs(out - ref)))

    # Case 2: F_out > F_in (aggregate-first path).
    x, adj, w, b = make_inputs(256, 128, 256, tag=2)
    out = jax.block_until_ready(simple_graph_convolution(x, adj, w, b))
    ref = ref_bf16(x, adj, w, b, transform_first=False)
    assert out.shape == (256, 256)
    assert jnp.allclose(out, ref, rtol=2e-3, atol=2e-3), \
        float(jnp.max(jnp.abs(out - ref)))

    # Case 3: f32 mode reproduces the original module's numerics.
    x, adj, w, b = make_inputs(256, 128, 128, tag=3)
    out = jax.block_until_ready(
        simple_graph_convolution(x, adj, w, b, compute_dtype=jnp.float32))
    ref = adj @ (x @ w) + b[None, :]
    assert jnp.allclose(out, ref, rtol=1e-4, atol=1e-4), \
        float(jnp.max(jnp.abs(out - ref)))

    print("KERNEL_OK")
</pallas_src>

<mosaic_0001>
module attributes {stable_mosaic.version = 11 : i64} {
  func.func @_dense_matmul_kernel(%arg0: i32, %arg1: memref<256x256xbf16, #tpu.memory_space<vmem>>, %arg2: memref<256x128xbf16, #tpu.memory_space<vmem>>, %arg3: memref<1x128xf32, #tpu.memory_space<vmem>>, %arg4: memref<256x128xbf16, #tpu.memory_space<vmem>>) attributes {dimension_semantics = [#tpu.dimension_semantics<parallel>], iteration_bounds = array<i64: 3>, scalar_prefetch = 0 : i64, scratch_operands = 0 : i64, tpu.core_type = #tpu.core_type<tc>, window_params = [{transform_indices = @transform_0, window_bounds = array<i64: 256, 256>}, {pipeline_mode = #tpu.pipeline_mode<synchronous>, transform_indices = @transform_1, window_bounds = array<i64: 256, 128>}, {pipeline_mode = #tpu.pipeline_mode<synchronous>, transform_indices = @transform_2, window_bounds = array<i64: 1, 128>}, {transform_indices = @transform_3, window_bounds = array<i64: 256, 128>}]} {
    %c0 = arith.constant 0 : index
    %c0_0 = arith.constant 0 : index
    %0 = vector.load %arg1[%c0, %c0_0] : memref<256x256xbf16, #tpu.memory_space<vmem>>, vector<256x256xbf16>
    %c0_1 = arith.constant 0 : index
    %c0_2 = arith.constant 0 : index
    %1 = vector.load %arg2[%c0_1, %c0_2] : memref<256x128xbf16, #tpu.memory_space<vmem>>, vector<256x128xbf16>
    %cst = arith.constant dense<0.000000e+00> : vector<256x128xf32>
    %2 = tpu.matmul %0, %1, %cst {dimension_numbers = #tpu.dot_dimension_numbers<[1], [0], [0], [1], [0, 0, 1, 1], [], []>} : vector<256x256xbf16>, vector<256x128xbf16>, vector<256x128xf32> -> vector<256x128xf32>
    %c0_3 = arith.constant 0 : index
    %c0_4 = arith.constant 0 : index
    %3 = vector.load %arg3[%c0_3, %c0_4] : memref<1x128xf32, #tpu.memory_space<vmem>>, vector<1x128xf32>
    %4 = vector.broadcast %3 : vector<1x128xf32> to vector<256x128xf32>
    %5 = arith.addf %2, %4 : vector<256x128xf32>
    %6 = arith.truncf %5 : vector<256x128xf32> to vector<256x128xbf16>
    %c0_5 = arith.constant 0 : index
    %c0_6 = arith.constant 0 : index
    %7 = vector.load %arg4[%c0_5, %c0_6] : memref<256x128xbf16, #tpu.memory_space<vmem>>, vector<256x128xbf16>
    tpu.vector_store %arg4[%c0_5, %c0_6], %6 {strides = array<i32>} : memref<256x128xbf16, #tpu.memory_space<vmem>>, vector<256x128xbf16>,
    return
  }
  func.func @transform_0(%arg0: i32) -> (i32, i32) {
    %c0_i32 = arith.constant 0 : i32
    %c0_i32_0 = arith.constant 0 : i32
    return %arg0, %c0_i32 : i32, i32
  }
  func.func @transform_1(%arg0: i32) -> (i32, i32) {
    %c0_i32 = arith.constant 0 : i32
    %c0_i32_0 = arith.constant 0 : i32
    %c0_i32_1 = arith.constant 0 : i32
    return %c0_i32, %c0_i32_0 : i32, i32
  }
  func.func @transform_2(%arg0: i32) -> (i32, i32) {
    %c0_i32 = arith.constant 0 : i32
    %c0_i32_0 = arith.constant 0 : i32
    %c0_i32_1 = arith.constant 0 : i32
    return %c0_i32, %c0_i32_0 : i32, i32
  }
  func.func @transform_3(%arg0: i32) -> (i32, i32) {
    %c0_i32 = arith.constant 0 : i32
    %c0_i32_0 = arith.constant 0 : i32
    return %arg0, %c0_i32 : i32, i32
  }
}

</mosaic_0001>

<bundles_post_ra>
// kernel: tpu_custom_call.1
= control target key start
LH: loop header
LB: loop body
LE: loop exit
PB: predicated region body
PF: predicated region fallthrough
CT: control target
= control target key end

     0   :  { %8 = vsyncpa [#allocation3], 0  ;;  %s1918_s0 = inlined_call_operand.hbm [shape: bf16[640,256], index: 0, kind: input, shape index: {}]   ;;  %s1919_s1 = inlined_call_operand.hbm [shape: bf16[256,128], index: 1, kind: input, shape index: {}]   ;;  %s1920_s2 = inlined_call_operand.vmem [shape: f32[1,128], index: 2, kind: input, shape index: {}]   ;;  %s1921_s3 = inlined_call_operand.hbm [shape: bf16[640,128], index: 3, kind: output, shape index: {}]  }
   0x1   :  { %10 = vsyncpa [#allocation3 + $0x1], 0 }
   0x2   :  { %11 = vsyncpa [#allocation6], 0 }
   0x3   :  { %12 = vsyncpa [#allocation4], 0 }
   0x4   :  { %14 = vsyncpa [#allocation4 + $0x1], 0  ;;  %s1618_s12 = smov 0   ;;  %s1620_s13 = smov 0  }
   0x5   :  { %s1622_s14 = smov 0   ;;  %s1624_s15 = smov 0  }
   0x6 LB: > { %s1639_s16 = sadd.s32 4294967295, %s1587_s15   ;;  %s975_s17 = sadd.s32 4294967294, %s1587_s15   ;;  %s1587_s15 = sphi %s1624_s15, %s1941_s15   ;;  %s1583_s14 = sphi %s1622_s14, %s1940_s14   ;;  %s1579_s13 = sphi %s1620_s13, %s1939_s13   ;;  %s1575_s12 = sphi %s1618_s12, %s1938_s12  }
   0x7   : > { %s1643_s18 = sadd.s32 1, %s1587_s15   ;;  %s27_s19 = sadd.s32 1, %s1583_s14 }
   0x8   : > { %s24_s20 = ssub.s32 %s1587_s15, %s1643_s18  ;;  %p34_p0 = scmp.ne.s32.totalorder %s1583_s14, %s1579_s13 }
   0x9   : > { %p25_p1 = scmp.eq.s32.totalorder %s24_s20, 0  ;;  %p35_p2 = scmp.eq.s32.totalorder %s1587_s15, 0 }
   0xa   : > { %p40_p3 = scmp.ne.s32.totalorder %s1579_s13, %s1575_s12  ;;  %p1922_p4 = scmp.eq.s32.totalorder %s1639_s16, 0 }
   0xb   : > { %s1655_s21 = scalar_select %p25_p1, %s1583_s14, %s27_s19  }
   0xc   : > { %p1657_p5 = por %p35_p2, %p34_p0  ;;  %p1663_p6 = por %p1922_p4, %p40_p3 }
   0xd   : > { %p106_p7 = scmp.eq.s32.totalorder %s1639_s16, 2  ;;  %p112_p8 = scmp.eq.s32.totalorder %s975_s17, 2 }
   0xe   : > { %s1925_s22 = scalar_select %p1657_p5, 1, 0 }
   0xf   : > { %s1926_s23 = scalar_select %p1663_p6, 1, 0 }
  0x10   : > { %p976_p9 = scmp.ge.s32.totalorder %s1587_s15, 1  ;;  %p119_p10 = scmp.lt.s32.totalorder %s1587_s15, 4 }
  0x11   : > { %p1670_p11 = por %p106_p7, %p34_p0  ;;  %p1674_p12 = por %p112_p8, %p40_p3 }
  0x12   : > { %p1678_p13 = pnand %p976_p9, %p119_p10  ;;  %s1589_s27 = smov [#allocation5]  }
  0x13   : > { %s1927_s24 = scalar_select %p1670_p11, 1, 0 }
  0x14   : > { %s1928_s25 = scalar_select %p1674_p12, 1, 0 }
  0x15   : > { %s1929_s26 = scalar_select %p1678_p13, 1, 0 }
  0x16   : > { %p1347_p1 = pneg %p1678_p13  ;;  %s131_s28 = sshll.u32 %s1589_s27, 4  ;;  %s132_s28 = int_to_ptr.vmem [resolvable:$true] %s131_s28 }
  0x17   : > { %s1461_s5 = scalar_lea.hbm %s1919_s1, 2048 }
  0x18   : > { %p1686_p2 = pnand %p1347_p1, %p1922_p4  ;;  %p1462_p0 = scmp.ne.s32.totalorder %s1919_s1, %s1461_s5 }
  0x19   : > { %p1468_p9 = scmp.lt.u32.totalorder %s1461_s5, %s1919_s1 }
  0x1a   : > { %p1463_p3 = pneg %p1686_p2 }
  0x1c   : > { %p1464_p7 = pnand %p1463_p3, %p1462_p0 }
  0x1e   : > { %p1465_p8 = pneg %p1464_p7 }
  0x20   : > { %p1470_p10 = pnand %p1468_p9, %p1465_p8 }
  0x22   : > { %1473 = shalt.err (!%p1470_p10)
}
  0x23   : > { %s1474_s10 = scalar_lea.vmem %s132_s28, 2048  ;;  %p1482_p11 = scmp.lt.s32.totalorder %s132_s28, %s132_s28 }
  0x24   : > { %p1475_p1 = scmp.ne.s32.totalorder %s132_s28, %s1474_s10  ;;  %p1483_p6 = scmp.lt.s32.totalorder %s1474_s10, %s1474_s10 }
  0x26   : > { %p1477_p4 = pnand %p1475_p1, %p1463_p3  ;;  %p1484_p13 = por %p1483_p6, %p1482_p11 }
  0x28   : > { %p1478_p12 = pneg %p1477_p4 }
  0x2a   : > { %p1485_p5 = pnand %p1484_p13, %p1478_p12 }
  0x2c   : > { %1488 = shalt.err (!%p1485_p5)
}
  0x2d   : > { %s1590_s11 = smov 64   ;;  %s1591_s17 = smov 4  }
  0x2e   : > { %1350 = dma.hbm_to_vmem [thread:$0]  (!%p1686_p2), %s1919_s1, 2048, %s132_s28, [#allocation6], %s1590_s11, %s1590_s11, %s1591_s17  }
  0x2f   : > { %p978_p0 = scmp.ge.s32.totalorder %s1587_s15, 3 }
  0x30   : > { %p1931_p7 = scmp.ne.s32.totalorder (!%p978_p0), %s1925_s22, 0 }
  0x31   : > { %144 = sbr.rel (%p978_p0) target bundleno = 91 (0x5b), region = 24 }
  0x38   : > { %147 = sbr.rel (!%p1931_p7) target bundleno = 91 (0x5b), region = 28  ;;  %s148_s27 = sand.u32 (%p1931_p7), 1, %s1583_s14  }
  0x39   : > { %s980_s30 = sshll.u32 (%p1931_p7), %s1587_s15, 5  ;;  %s979_s4 = sshll.u32 (%p1931_p7), %s148_s27, 8 }
  0x3a   : > { %s154_s5 = ssub.s32 (%p1931_p7), 80, %s980_s30  ;;  %s1714_s7 = scalar_lea.sflag (%p1931_p7), [#allocation3], %s148_s27 }
  0x3b   : > { %p155_p4 = scmp.lt.s32.totalorder (%p1931_p7), %s154_s5, 32  ;;  %s152_s28 = scalar_lea.vmem (%p1931_p7), [#allocation2], %s979_s4 }
  0x3f   : > { %s1943_s5 = smov (!%p155_p4, %s154_s5), 32 }
  0x40   : > { %s1711_s6 = sshll.u32 %s1943_s5, 7 }
  0x41   : > { %s160_s29 = ssub.s32 4096, %s1711_s6 }
  0x42   : > { %161 = vsyncadd %s1714_s7, %s160_s29  ;;  %p983_p5 = scmp.ne.s32.totalorder %s1711_s6, 0  ;;  %s1084_s22 = sshll.u32 %s1587_s15, 12 }
  0x43   : > { %s1722_s10 = scalar_lea.hbm %s1918_s0, %s1084_s22  ;;  %s167_s11 = sshll.u32 %s152_s28, 4  ;;  %s1724_s11 = int_to_ptr.vmem [resolvable:$true] %s167_s11 }
  0x44   : > { %s1489_s17 = scalar_lea.hbm %s1722_s10, %s1711_s6  ;;  %s1493_s27 = scalar_lea.hbm %s1918_s0, 10240 }
  0x45   : > { %p1490_p6 = scmp.ne.s32.totalorder %s1722_s10, %s1489_s17  ;;  %p1494_p13 = scmp.lt.u32.totalorder %s1722_s10, %s1918_s0 }
  0x46   : > { %p1495_p2 = scmp.lt.u32.totalorder %s1493_s27, %s1489_s17  ;;  %p1497_p8 = scmp.lt.u32.totalorder %s1489_s17, %s1722_s10 }
  0x47   : > { %p1491_p11 = pnand %p1490_p6, %p983_p5 }
  0x48   : > { %p1496_p3 = por %p1495_p2, %p1494_p13 }
  0x49   : > { %p1492_p12 = pneg %p1491_p11 }
  0x4a   : > { %p1498_p9 = por %p1497_p8, %p1496_p3 }
  0x4c   : > { %p1499_p10 = pnand %p1498_p9, %p1492_p12 }
  0x4e   : > { %1502 = shalt.err (!%p1499_p10)
}
  0x4f   : > { %s1503_s5 = scalar_lea.vmem %s1724_s11, %s1711_s6  ;;  %s1592_s29 = smov [#allocation2]  }
  0x50   : > { %p1504_p1 = scmp.ne.s32.totalorder %s1724_s11, %s1503_s5  ;;  %s1507_s28 = sshll.u32 %s1592_s29, 4  ;;  %s1508_s28 = int_to_ptr.vmem [resolvable:$false] %s1507_s28 }
  0x51   : > { %s1509_s22 = scalar_lea.vmem %s1508_s28, 8192  ;;  %p1510_p4 = scmp.lt.s32.totalorder %s1724_s11, %s1508_s28 }
  0x52   : > { %p1505_p0 = pnand %p1504_p1, %p983_p5  ;;  %p1511_p6 = scmp.lt.s32.totalorder %s1509_s22, %s1503_s5 }
  0x54   : > { %p1506_p7 = pneg %p1505_p0  ;;  %p1512_p11 = por %p1511_p6, %p1510_p4 }
  0x56   : > { %p1513_p13 = pnand %p1512_p11, %p1506_p7 }
  0x58   : > { %1516 = shalt.err (!%p1513_p13)
}
  0x59   : > { %s1593_s8 = smov 128   ;;  %s1594_s9 = smov 8  }
  0x5a   : > { %173 = dma.hbm_to_vmem [thread:$0]  (%p983_p5), %s1722_s10, %s1711_s6, %s1724_s11, %s1714_s7, %s1593_s8, %s1593_s8, %s1594_s9  }
  0x5b PF: > { %p1932_p12 = scmp.ne.s32.totalorder %s1929_s26, 0 }
  0x5c   : > { %s1754_s17 = sand.u32 (!%p1932_p12), 1, %s1579_s13   ;;  %p1933_p2 = scmp.ne.s32.totalorder (!%p1932_p12), %s1926_s23, 0 }
  0x5d   : > { %179 = sbr.rel (%p1932_p12) target bundleno = 443 (0x1bb), region = 32  ;;  %s989_s19 = sshll.u32 (!%p1932_p12), %s1754_s17, 8 }
  0x5e   : > { %s182_s20 = scalar_lea.sflag (!%p1932_p12), [#allocation3], %s1754_s17  ;;  %s1758_s27 = scalar_lea.vmem (!%p1932_p12), [#allocation2], %s989_s19 }
  0x64   : > { %1562 = dma.done.wait (%p1933_p2), %s182_s20, 4096  }
  0x65   : > { %1564 = vsyncadd (%p1933_p2), %s182_s20, 4294963200  ;;  %p1934_p5 = scmp.eq.s32.totalorder %s1639_s16, 0 }
  0x67   : > { %1566 = dma.done.wait (%p1934_p5), [#allocation6], 2048   ;;  %p1935_p3 = pmov %p1934_p5 }
  0x68   : > { %v1397_v0 = vld [vmem:[#allocation5 + $0x40] sm:$0xff]   ;;  %v1399_v2 = vld [vmem:[#allocation5 + $0x48] sm:$0xff]   ;;  %v1401_v4 = vld [vmem:[#allocation5 + $0x50] sm:$0xff]   ;;  %s991_s6 = sshll.u32 %s1754_s17, 7  ;;  %s873_s10 = scalar_lea.sflag [#allocation4], %s1754_s17 }
  0x69   : > { %1568 = vsyncadd (%p1935_p3), [#allocation6], 4294965248  ;;  %v1398_v1 = vld [vmem:[#allocation5] sm:$0xff]   ;;  %1213 = vmatprep.subr.bf16.mxu0 %v1397_v0  ;;  %1325 = vmatprep.subr.bf16.mxu1 %v1397_v0  ;;  %v1400_v3 = vld [vmem:[#allocation5 + $0x8] sm:$0xff]   ;;  %s1810_s7 = scalar_lea.vmem [#allocation7], %s991_s6  ;;  %p1936_p8 = scmp.ne.s32.totalorder %s1927_s24, 0 }
  0x6a   : > { %1214 = vmatpush3.bf16.msra.mxu0 %v1398_v1  ;;  %1333 = vmatpush3.bf16.msra.mxu1 %v1398_v1  ;;  %v1402_v5 = vld [vmem:[#allocation5 + $0x10] sm:$0xff]   ;;  %v1403_v6 = vld [vmem:[#allocation5 + $0x58] sm:$0xff]   ;;  %v1405_v8 = vld [vmem:[#allocation5 + $0x60] sm:$0xff]   ;;  %s1074_s11 = sshll.u32 (%p1936_p8), %s1639_s16, 5 }
  0x6b   : > { %1215 = vmatprep.subr.bf16.mxu0 %v1399_v2  ;;  %1326 = vmatprep.subr.bf16.mxu1 %v1399_v2  ;;  %v1404_v7 = vld [vmem:[#allocation5 + $0x18] sm:$0xff]   ;;  %v1406_v9 = vld [vmem:[#allocation5 + $0x20] sm:$0xff]   ;;  %v1407_v10 = vld [vmem:[#allocation5 + $0x68] sm:$0xff]   ;;  %s881_s30 = ssub.s32 (%p1936_p8), 80, %s1074_s11 }
  0x6c   : > { %v1415_v11 = vld [vmem:[%s1758_s27 + $0x4] ss:$8 sps:$4 sm:$0xff]   ;;  %v1409_v14 = vld [vmem:[#allocation5 + $0x70] sm:$0xff]   ;;  %v1411_v16 = vld [vmem:[#allocation5 + $0x78] sm:$0xff]   ;;  %p882_p9 = scmp.lt.s32.totalorder (%p1936_p8), %s881_s30, 32 }
  0x6d   : > { %v1418_v12 = vld [vmem:[%s1758_s27 + $0x84] ss:$8 sps:$4 sm:$0xff]   ;;  %583 = vmatprep.mubr.bf16.mxu0 %v1415_v11  ;;  %v1410_v15 = vld [vmem:[#allocation5 + $0x30] sm:$0xff]   ;;  %v1412_v17 = vld [vmem:[#allocation5 + $0x38] sm:$0xff]  }
  0x6e   : > { %1216 = vmatpush3.bf16.msra.mxu0 %v1400_v3  ;;  %1334 = vmatpush3.bf16.msra.mxu1 %v1400_v3  ;;  %v1408_v13 = vld [vmem:[#allocation5 + $0x28] sm:$0xff]   ;;  %v1419_v20 = vld [vmem:[%s1758_s27 + $0x14] ss:$8 sps:$4 sm:$0xff]   ;;  %v1423_v22 = vld [vmem:[%s1758_s27 + $0x10] ss:$8 sps:$4 sm:$0xff]  }
  0x6f   : > { %1217 = vmatprep.subr.bf16.mxu0 %v1401_v4  ;;  %1327 = vmatprep.subr.bf16.mxu1 %v1401_v4  ;;  %v1413_v18 = vld [vmem:[%s1758_s27] ss:$8 sps:$4 sm:$0xff]   ;;  %v1421_v21 = vld [vmem:[%s1758_s27 + $0x94] ss:$8 sps:$4 sm:$0xff]   ;;  %v1424_v23 = vld [vmem:[%s1758_s27 + $0x90] ss:$8 sps:$4 sm:$0xff]  }
  0x70   : > { %647 = vmatprep.mubr.bf16.mxu1 %v1418_v12  ;;  %v1416_v19 = vld [vmem:[%s1758_s27 + $0x80] ss:$8 sps:$4 sm:$0xff]   ;;  %v1425_v24 = vld [vmem:[%s1758_s27 + $0x24] ss:$8 sps:$4 sm:$0xff]   ;;  %v1431_v28 = vld [vmem:[%s1758_s27 + $0x34] ss:$8 sps:$4 sm:$0xff]  }
  0x71   : > { %v1427_v25 = vld [vmem:[%s1758_s27 + $0xa4] ss:$8 sps:$4 sm:$0xff]   ;;  %v1429_v26 = vld [vmem:[%s1758_s27 + $0x20] ss:$8 sps:$4 sm:$0xff]   ;;  %v1433_v29 = vld [vmem:[%s1758_s27 + $0xb4] ss:$8 sps:$4 sm:$0xff]  }
  0x72   : > { %1218 = vmatpush3.bf16.msra.mxu0 %v1402_v5  ;;  %1335 = vmatpush3.bf16.msra.mxu1 %v1402_v5  ;;  %v1430_v27 = vld [vmem:[%s1758_s27 + $0xa0] ss:$8 sps:$4 sm:$0xff]   ;;  %v1435_v30 = vld [vmem:[%s1758_s27 + $0x30] ss:$8 sps:$4 sm:$0xff]   ;;  %v1437_v32 = vld [vmem:[%s1758_s27 + $0x44] ss:$8 sps:$4 sm:$0xff]  }
  0x73   : > { %1219 = vmatprep.subr.bf16.mxu0 %v1403_v6  ;;  %1328 = vmatprep.subr.bf16.mxu1 %v1403_v6  ;;  %v1436_v31 = vld [vmem:[%s1758_s27 + $0xb0] ss:$8 sps:$4 sm:$0xff]   ;;  %v1439_v33 = vld [vmem:[%s1758_s27 + $0xc4] ss:$8 sps:$4 sm:$0xff]   ;;  %v1441_v34 = vld [vmem:[%s1758_s27 + $0x40] ss:$8 sps:$4 sm:$0xff]  }
  0x74   : > { %v1442_v35 = vld [vmem:[%s1758_s27 + $0xc0] ss:$8 sps:$4 sm:$0xff]   ;;  %v1443_v36 = vld [vmem:[%s1758_s27 + $0x54] ss:$8 sps:$4 sm:$0xff]   ;;  %v1447_v38 = vld [vmem:[%s1758_s27 + $0x50] ss:$8 sps:$4 sm:$0xff]  }
  0x75   : > { %v1445_v37 = vld [vmem:[%s1758_s27 + $0xd4] ss:$8 sps:$4 sm:$0xff]   ;;  %v1448_v39 = vld [vmem:[%s1758_s27 + $0xd0] ss:$8 sps:$4 sm:$0xff]   ;;  %v1449_v40 = vld [vmem:[%s1758_s27 + $0x64] ss:$8 sps:$4 sm:$0xff]  }
  0x76   : > { %1220 = vmatpush3.bf16.msra.mxu0 %v1404_v7  ;;  %1336 = vmatpush3.bf16.msra.mxu1 %v1404_v7  ;;  %v1451_v41 = vld [vmem:[%s1758_s27 + $0xe4] ss:$8 sps:$4 sm:$0xff]   ;;  %v1453_v42 = vld [vmem:[%s1758_s27 + $0x60] ss:$8 sps:$4 sm:$0xff]   ;;  %v1455_v44 = vld [vmem:[%s1758_s27 + $0x74] ss:$8 sps:$4 sm:$0xff]  }
  0x77   : > { %1221 = vmatprep.subr.bf16.mxu0 %v1405_v8  ;;  %1329 = vmatprep.subr.bf16.mxu1 %v1405_v8  ;;  %v1454_v43 = vld [vmem:[%s1758_s27 + $0xe0] ss:$8 sps:$4 sm:$0xff]   ;;  %v1457_v45 = vld [vmem:[%s1758_s27 + $0xf4] ss:$8 sps:$4 sm:$0xff]   ;;  %v1459_v46 = vld [vmem:[%s1758_s27 + $0x70] ss:$8 sps:$4 sm:$0xff]  }
  0x78   : > { %v1460_v47 = vld [vmem:[%s1758_s27 + $0xf0] ss:$8 sps:$4 sm:$0xff]   ;;  %v1803_v56 = vld [vmem:[%s1920_s2] ss:$0 sm:$0xff] }
  0x7a   : > { %1222 = vmatpush3.bf16.msra.mxu0 %v1406_v9  ;;  %1337 = vmatpush3.bf16.msra.mxu1 %v1406_v9 }
  0x7b   : > { %1223 = vmatprep.subr.bf16.mxu0 %v1407_v10  ;;  %1330 = vmatprep.subr.bf16.mxu1 %v1407_v10 }
  0x7e   : > { %1224 = vmatpush3.bf16.msra.mxu0 %v1408_v13  ;;  %1338 = vmatpush3.bf16.msra.mxu1 %v1408_v13 }
  0x7f   : > { %1225 = vmatprep.subr.bf16.mxu0 %v1409_v14  ;;  %1331 = vmatprep.subr.bf16.mxu1 %v1409_v14 }
  0x82   : > { %1226 = vmatpush3.bf16.msra.mxu0 %v1410_v15  ;;  %1339 = vmatpush3.bf16.msra.mxu1 %v1410_v15 }
  0x83   : > { %1227 = vmatprep.subr.bf16.mxu0 %v1411_v16  ;;  %1332 = vmatprep.subr.bf16.mxu1 %v1411_v16 }
  0x86   : > { %1228 = vmatpush3.bf16.msra.mxu0 %v1412_v17  ;;  %1340 = vmatpush3.bf16.msra.mxu1 %v1412_v17 }
  0x89   : > { %584 = vmatmul.mubr.bf16.vlgmr.msra.gmra.mrb[0].mxu0 %v1413_v18  ;;  %648 = vmatmul.mubr.bf16.vlgmr.msra.gmra.mrb[0].mxu1 %v1416_v19 }
  0x8a   : > { %591 = vmatprep.mubr.bf16.mxu0 %v1419_v20  ;;  %655 = vmatprep.mubr.bf16.mxu1 %v1421_v21 }
  0x91   : > { %592 = vmatmul.mubr.bf16.gmra.mrb[4].mxu0 %v1423_v22  ;;  %656 = vmatmul.mubr.bf16.gmra.mrb[4].mxu1 %v1424_v23 }
  0x92   : > { %599 = vmatprep.mubr.bf16.mxu0 %v1425_v24  ;;  %663 = vmatprep.mubr.bf16.mxu1 %v1427_v25 }
  0x99   : > { %600 = vmatmul.mubr.bf16.gmra.mrb[8].mxu0 %v1429_v26  ;;  %664 = vmatmul.mubr.bf16.gmra.mrb[8].mxu1 %v1430_v27 }
  0x9a   : > { %607 = vmatprep.mubr.bf16.mxu0 %v1431_v28  ;;  %671 = vmatprep.mubr.bf16.mxu1 %v1433_v29 }
  0xa1   : > { %608 = vmatmul.mubr.bf16.gmra.mrb[12].mxu0 %v1435_v30  ;;  %672 = vmatmul.mubr.bf16.gmra.mrb[12].mxu1 %v1436_v31 }
  0xa2   : > { %615 = vmatprep.mubr.bf16.mxu0 %v1437_v32  ;;  %679 = vmatprep.mubr.bf16.mxu1 %v1439_v33 }
  0xa9   : > { %616 = vmatmul.mubr.bf16.gmra.mrb[16].mxu0 %v1441_v34  ;;  %680 = vmatmul.mubr.bf16.gmra.mrb[16].mxu1 %v1442_v35 }
  0xaa   : > { %623 = vmatprep.mubr.bf16.mxu0 %v1443_v36  ;;  %687 = vmatprep.mubr.bf16.mxu1 %v1445_v37 }
  0xb1   : > { %624 = vmatmul.mubr.bf16.gmra.mrb[20].mxu0 %v1447_v38  ;;  %688 = vmatmul.mubr.bf16.gmra.mrb[20].mxu1 %v1448_v39 }
  0xb2   : > { %631 = vmatprep.mubr.bf16.mxu0 %v1449_v40  ;;  %695 = vmatprep.mubr.bf16.mxu1 %v1451_v41 }
  0xb9   : > { %632 = vmatmul.mubr.bf16.gmra.mrb[24].mxu0 %v1453_v42  ;;  %696 = vmatmul.mubr.bf16.gmra.mrb[24].mxu1 %v1454_v43 }
  0xba   : > { %639 = vmatprep.mubr.bf16.mxu0 %v1455_v44  ;;  %703 = vmatprep.mubr.bf16.mxu1 %v1457_v45 }
  0xc1   : > { %640 = vmatmul.mubr.bf16.gmra.mrb[28].mxu0 %v1459_v46  ;;  %704 = vmatmul.mubr.bf16.gmra.mrb[28].mxu1 %v1460_v47 }
 0x15c   : > { %v1229_v48 = vpop.f32.mrb[0].mxu0  ;;  %v1277_v49 = vpop.f32.mrb[0].mxu1 }
 0x15d   : > { %v1230_v50 = vpop.f32.mrb[1].mxu0  ;;  %v1278_v51 = vpop.f32.mrb[1].mxu1 }
 0x15e   : > { %v1231_v52 = vadd.f32 %v1230_v50, %v1229_v48  ;;  %v1279_v53 = vadd.f32 %v1278_v51, %v1277_v49  ;;  %v1232_v54 = vpop.f32.mrb[2].mxu0  ;;  %v1280_v55 = vpop.f32.mrb[2].mxu1 }
 0x15f   : > { %v1233_v57 = vpop.f32.mrb[3].mxu0  ;;  %v1281_v58 = vpop.f32.mrb[3].mxu1 }
 0x160   : > { %v1234_v59 = vadd.f32 %v1233_v57, %v1232_v54  ;;  %v1282_v60 = vadd.f32 %v1281_v58, %v1280_v55  ;;  %v586_v61 = vadd.f32 %v1231_v52, %v1803_v56  ;;  %v650_v62 = vadd.f32 %v1279_v53, %v1803_v56 }
 0x162   : > { %v589_v63 = vadd.f32 %v1234_v59, %v1803_v56  ;;  %v653_v0 = vadd.f32 %v1282_v60, %v1803_v56 }
 0x164   : > { %v1121_v1 = vpack.c.bf16 %v589_v63, %v586_v61  ;;  %v1161_v2 = vpack.c.bf16 %v653_v0, %v650_v62  ;;  %v1235_v3 = vpop.f32.mrb[4].mxu0  ;;  %v1283_v4 = vpop.f32.mrb[4].mxu1 }
 0x165   : > { %v1236_v5 = vpop.f32.mrb[5].mxu0  ;;  %v1284_v6 = vpop.f32.mrb[5].mxu1 }
 0x166   : > { %1122 = vst [vmem:[%s1810_s7] sm:$0xff] %v1121_v1   ;;  %1205 = vst [vmem:[%s1810_s7 + $0x40] sm:$0xff] %v1161_v2   ;;  %v1237_v7 = vadd.f32 %v1236_v5, %v1235_v3  ;;  %v1285_v8 = vadd.f32 %v1284_v6, %v1283_v4  ;;  %v1238_v9 = vpop.f32.mrb[6].mxu0  ;;  %v1286_v10 = vpop.f32.mrb[6].mxu1 }
 0x167   : > { %v1239_v11 = vpop.f32.mrb[7].mxu0  ;;  %v1287_v12 = vpop.f32.mrb[7].mxu1 }
 0x168   : > { %v1240_v13 = vadd.f32 %v1239_v11, %v1238_v9  ;;  %v1288_v14 = vadd.f32 %v1287_v12, %v1286_v10  ;;  %v594_v15 = vadd.f32 %v1237_v7, %v1803_v56  ;;  %v658_v16 = vadd.f32 %v1285_v8, %v1803_v56 }
 0x16a   : > { %v597_v17 = vadd.f32 %v1240_v13, %v1803_v56  ;;  %v661_v18 = vadd.f32 %v1288_v14, %v1803_v56 }
 0x16c   : > { %v1126_v19 = vpack.c.bf16 %v597_v17, %v594_v15  ;;  %v1166_v20 = vpack.c.bf16 %v661_v18, %v658_v16  ;;  %v1241_v21 = vpop.f32.mrb[8].mxu0  ;;  %v1289_v22 = vpop.f32.mrb[8].mxu1 }
 0x16d   : > { %v1242_v23 = vpop.f32.mrb[9].mxu0  ;;  %v1290_v24 = vpop.f32.mrb[9].mxu1 }
 0x16e   : > { %1198 = vst [vmem:[%s1810_s7 + $0x8] sm:$0xff] %v1126_v19   ;;  %1206 = vst [vmem:[%s1810_s7 + $0x48] sm:$0xff] %v1166_v20   ;;  %v1243_v25 = vadd.f32 %v1242_v23, %v1241_v21  ;;  %v1291_v26 = vadd.f32 %v1290_v24, %v1289_v22  ;;  %v1244_v27 = vpop.f32.mrb[10].mxu0  ;;  %v1292_v28 = vpop.f32.mrb[10].mxu1 }
 0x16f   : > { %v1245_v29 = vpop.f32.mrb[11].mxu0  ;;  %v1293_v30 = vpop.f32.mrb[11].mxu1 }
 0x170   : > { %v1246_v31 = vadd.f32 %v1245_v29, %v1244_v27  ;;  %v1294_v32 = vadd.f32 %v1293_v30, %v1292_v28  ;;  %v602_v33 = vadd.f32 %v1243_v25, %v1803_v56  ;;  %v666_v34 = vadd.f32 %v1291_v26, %v1803_v56 }
 0x172   : > { %v605_v35 = vadd.f32 %v1246_v31, %v1803_v56  ;;  %v669_v36 = vadd.f32 %v1294_v32, %v1803_v56 }
 0x174   : > { %v1131_v37 = vpack.c.bf16 %v605_v35, %v602_v33  ;;  %v1171_v38 = vpack.c.bf16 %v669_v36, %v666_v34  ;;  %v1247_v39 = vpop.f32.mrb[12].mxu0  ;;  %v1295_v40 = vpop.f32.mrb[12].mxu1 }
 0x175   : > { %v1248_v41 = vpop.f32.mrb[13].mxu0  ;;  %v1296_v42 = vpop.f32.mrb[13].mxu1 }
 0x176   : > { %1199 = vst [vmem:[%s1810_s7 + $0x10] sm:$0xff] %v1131_v37   ;;  %1207 = vst [vmem:[%s1810_s7 + $0x50] sm:$0xff] %v1171_v38   ;;  %v1249_v43 = vadd.f32 %v1248_v41, %v1247_v39  ;;  %v1297_v44 = vadd.f32 %v1296_v42, %v1295_v40  ;;  %v1250_v45 = vpop.f32.mrb[14].mxu0  ;;  %v1298_v46 = vpop.f32.mrb[14].mxu1 }
 0x177   : > { %v1251_v47 = vpop.f32.mrb[15].mxu0  ;;  %v1299_v48 = vpop.f32.mrb[15].mxu1 }
 0x178   : > { %v1252_v49 = vadd.f32 %v1251_v47, %v1250_v45  ;;  %v1300_v50 = vadd.f32 %v1299_v48, %v1298_v46  ;;  %v610_v51 = vadd.f32 %v1249_v43, %v1803_v56  ;;  %v674_v52 = vadd.f32 %v1297_v44, %v1803_v56 }
 0x17a   : > { %v613_v53 = vadd.f32 %v1252_v49, %v1803_v56  ;;  %v677_v54 = vadd.f32 %v1300_v50, %v1803_v56 }
 0x17c   : > { %v1136_v55 = vpack.c.bf16 %v613_v53, %v610_v51  ;;  %v1176_v57 = vpack.c.bf16 %v677_v54, %v674_v52  ;;  %v1253_v58 = vpop.f32.mrb[16].mxu0  ;;  %v1301_v59 = vpop.f32.mrb[16].mxu1 }
 0x17d   : > { %v1254_v60 = vpop.f32.mrb[17].mxu0  ;;  %v1302_v61 = vpop.f32.mrb[17].mxu1 }
 0x17e   : > { %1200 = vst [vmem:[%s1810_s7 + $0x18] sm:$0xff] %v1136_v55   ;;  %1208 = vst [vmem:[%s1810_s7 + $0x58] sm:$0xff] %v1176_v57   ;;  %v1255_v62 = vadd.f32 %v1254_v60, %v1253_v58  ;;  %v1303_v63 = vadd.f32 %v1302_v61, %v1301_v59  ;;  %v1256_v0 = vpop.f32.mrb[18].mxu0  ;;  %v1304_v1 = vpop.f32.mrb[18].mxu1 }
 0x17f   : > { %v1257_v2 = vpop.f32.mrb[19].mxu0  ;;  %v1305_v3 = vpop.f32.mrb[19].mxu1 }
 0x180   : > { %v1258_v4 = vadd.f32 %v1257_v2, %v1256_v0  ;;  %v1306_v5 = vadd.f32 %v1305_v3, %v1304_v1  ;;  %v618_v6 = vadd.f32 %v1255_v62, %v1803_v56  ;;  %v682_v7 = vadd.f32 %v1303_v63, %v1803_v56 }
 0x182   : > { %v621_v8 = vadd.f32 %v1258_v4, %v1803_v56  ;;  %v685_v9 = vadd.f32 %v1306_v5, %v1803_v56 }
 0x184   : > { %v1141_v10 = vpack.c.bf16 %v621_v8, %v618_v6  ;;  %v1181_v11 = vpack.c.bf16 %v685_v9, %v682_v7  ;;  %v1259_v12 = vpop.f32.mrb[20].mxu0  ;;  %v1307_v13 = vpop.f32.mrb[20].mxu1 }
 0x185   : > { %v1260_v14 = vpop.f32.mrb[21].mxu0  ;;  %v1308_v15 = vpop.f32.mrb[21].mxu1 }
 0x186   : > { %1201 = vst [vmem:[%s1810_s7 + $0x20] sm:$0xff] %v1141_v10   ;;  %1209 = vst [vmem:[%s1810_s7 + $0x60] sm:$0xff] %v1181_v11   ;;  %v1261_v16 = vadd.f32 %v1260_v14, %v1259_v12  ;;  %v1309_v17 = vadd.f32 %v1308_v15, %v1307_v13  ;;  %v1262_v18 = vpop.f32.mrb[22].mxu0  ;;  %v1310_v19 = vpop.f32.mrb[22].mxu1 }
 0x187   : > { %v1263_v20 = vpop.f32.mrb[23].mxu0  ;;  %v1311_v21 = vpop.f32.mrb[23].mxu1 }
 0x188   : > { %v1264_v22 = vadd.f32 %v1263_v20, %v1262_v18  ;;  %v1312_v23 = vadd.f32 %v1311_v21, %v1310_v19  ;;  %v626_v24 = vadd.f32 %v1261_v16, %v1803_v56  ;;  %v690_v25 = vadd.f32 %v1309_v17, %v1803_v56 }
 0x18a   : > { %v629_v26 = vadd.f32 %v1264_v22, %v1803_v56  ;;  %v693_v27 = vadd.f32 %v1312_v23, %v1803_v56 }
 0x18c   : > { %v1146_v28 = vpack.c.bf16 %v629_v26, %v626_v24  ;;  %v1186_v29 = vpack.c.bf16 %v693_v27, %v690_v25  ;;  %v1265_v30 = vpop.f32.mrb[24].mxu0  ;;  %v1313_v31 = vpop.f32.mrb[24].mxu1 }
 0x18d   : > { %v1266_v32 = vpop.f32.mrb[25].mxu0  ;;  %v1314_v33 = vpop.f32.mrb[25].mxu1 }
 0x18e   : > { %1202 = vst [vmem:[%s1810_s7 + $0x28] sm:$0xff] %v1146_v28   ;;  %1210 = vst [vmem:[%s1810_s7 + $0x68] sm:$0xff] %v1186_v29   ;;  %v1267_v34 = vadd.f32 %v1266_v32, %v1265_v30  ;;  %v1315_v35 = vadd.f32 %v1314_v33, %v1313_v31  ;;  %v1268_v36 = vpop.f32.mrb[26].mxu0  ;;  %v1316_v37 = vpop.f32.mrb[26].mxu1 }
 0x18f   : > { %v1269_v38 = vpop.f32.mrb[27].mxu0  ;;  %v1317_v39 = vpop.f32.mrb[27].mxu1 }
 0x190   : > { %v1270_v40 = vadd.f32 %v1269_v38, %v1268_v36  ;;  %v1318_v41 = vadd.f32 %v1317_v39, %v1316_v37  ;;  %v634_v42 = vadd.f32 %v1267_v34, %v1803_v56  ;;  %v698_v43 = vadd.f32 %v1315_v35, %v1803_v56 }
 0x192   : > { %v637_v44 = vadd.f32 %v1270_v40, %v1803_v56  ;;  %v701_v45 = vadd.f32 %v1318_v41, %v1803_v56 }
 0x194   : > { %v1151_v46 = vpack.c.bf16 %v637_v44, %v634_v42  ;;  %v1191_v47 = vpack.c.bf16 %v701_v45, %v698_v43  ;;  %v1271_v48 = vpop.f32.mrb[28].mxu0  ;;  %v1319_v49 = vpop.f32.mrb[28].mxu1 }
 0x195   : > { %v1272_v50 = vpop.f32.mrb[29].mxu0  ;;  %v1320_v51 = vpop.f32.mrb[29].mxu1 }
 0x196   : > { %1203 = vst [vmem:[%s1810_s7 + $0x30] sm:$0xff] %v1151_v46   ;;  %1211 = vst [vmem:[%s1810_s7 + $0x70] sm:$0xff] %v1191_v47   ;;  %v1273_v52 = vadd.f32 %v1272_v50, %v1271_v48  ;;  %v1321_v53 = vadd.f32 %v1320_v51, %v1319_v49  ;;  %v1274_v54 = vpop.f32.mrb[30].mxu0  ;;  %v1322_v55 = vpop.f32.mrb[30].mxu1 }
 0x197   : > { %v1275_v57 = vpop.f32.mrb[31].mxu0  ;;  %v1323_v58 = vpop.f32.mrb[31].mxu1 }
 0x198   : > { %v1276_v59 = vadd.f32 %v1275_v57, %v1274_v54  ;;  %v1324_v60 = vadd.f32 %v1323_v58, %v1322_v55  ;;  %v642_v61 = vadd.f32 %v1273_v52, %v1803_v56  ;;  %v706_v62 = vadd.f32 %v1321_v53, %v1803_v56  ;;  %879 = sbr.rel (!%p1936_p8) target bundleno = 443 (0x1bb), region = 44 }
 0x19a   : > { %v645_v63 = vadd.f32 %v1276_v59, %v1803_v56  ;;  %v709_v0 = vadd.f32 %v1324_v60, %v1803_v56 }
 0x19c   : > { %v1156_v1 = vpack.c.bf16 %v645_v63, %v642_v61  ;;  %v1196_v2 = vpack.c.bf16 %v709_v0, %v706_v62 }
 0x19e   : > { %1204 = vst [vmem:[%s1810_s7 + $0x38] sm:$0xff] %v1156_v1   ;;  %1212 = vst [vmem:[%s1810_s7 + $0x78] sm:$0xff] %v1196_v2  }
 0x19f   : > { %s1945_s30 = smov (!%p882_p9, %s881_s30), 32 }
 0x1a0   : > { %s1860_s4 = sshll.u32 %s1945_s30, 6 }
 0x1a1   : > { %s886_s5 = ssub.s32 2048, %s1860_s4 }
 0x1a2   : > { %887 = vsyncadd %s873_s10, %s886_s5  ;;  %p1076_p10 = scmp.ne.s32.totalorder %s1860_s4, 0  ;;  %s1117_s24 = sshll.u32 %s1639_s16, 11 }
 0x1a3   : > { %s1870_s22 = scalar_lea.hbm %s1921_s3, %s1117_s24  ;;  %s892_s8 = sshll.u32 %s1810_s7, 4  ;;  %s1873_s8 = int_to_ptr.vmem [resolvable:$true] %s892_s8 }
 0x1a4   : > { %s1517_s9 = scalar_lea.vmem %s1873_s8, %s1860_s4  ;;  %s1595_s19 = smov [#allocation7]  }
 0x1a5   : > { %p1518_p1 = scmp.ne.s32.totalorder %s1873_s8, %s1517_s9  ;;  %s1521_s20 = sshll.u32 %s1595_s19, 4  ;;  %s1522_s20 = int_to_ptr.vmem [resolvable:$false] %s1521_s20 }
 0x1a6   : > { %s1523_s16 = scalar_lea.vmem %s1522_s20, 4096  ;;  %p1524_p4 = scmp.lt.s32.totalorder %s1873_s8, %s1522_s20 }
 0x1a7   : > { %p1519_p0 = pnand %p1518_p1, %p1076_p10  ;;  %p1525_p6 = scmp.lt.s32.totalorder %s1523_s16, %s1517_s9 }
 0x1a9   : > { %p1520_p7 = pneg %p1519_p0  ;;  %p1526_p11 = por %p1525_p6, %p1524_p4 }
 0x1ab   : > { %p1527_p13 = pnand %p1526_p11, %p1520_p7 }
 0x1ad   : > { %1530 = shalt.err (!%p1527_p13)
}
 0x1ae   : > { %s1531_s27 = scalar_lea.hbm %s1870_s22, %s1860_s4  ;;  %s1535_s6 = scalar_lea.hbm %s1921_s3, 5120 }
 0x1af   : > { %p1532_p12 = scmp.ne.s32.totalorder %s1870_s22, %s1531_s27  ;;  %p1536_p3 = scmp.lt.u32.totalorder %s1870_s22, %s1921_s3 }
 0x1b0   : > { %p1537_p8 = scmp.lt.u32.totalorder %s1535_s6, %s1531_s27  ;;  %p1539_p1 = scmp.lt.u32.totalorder %s1531_s27, %s1870_s22 }
 0x1b1   : > { %p1533_p2 = pnand %p1532_p12, %p1076_p10 }
 0x1b2   : > { %p1538_p9 = por %p1537_p8, %p1536_p3 }
 0x1b3   : > { %p1534_p5 = pneg %p1533_p2 }
 0x1b4   : > { %p1540_p0 = por %p1539_p1, %p1538_p9 }
 0x1b6   : > { %p1541_p7 = pnand %p1540_p0, %p1534_p5 }
 0x1b8   : > { %1544 = shalt.err (!%p1541_p7)
}
 0x1b9   : > { %s1596_s30 = smov 64   ;;  %s1597_s5 = smov 4  }
 0x1ba   : > { %898 = dma.vmem_to_hbm [thread:$0]  (%p1076_p10), %s1873_s8, %s1860_s4, %s1870_s22, %s873_s10, %s1596_s30, %s1596_s30, %s1597_s5  }
 0x1bb PF: > { %p1357_p4 = scmp.ge.s32.totalorder %s1587_s15, 2  ;;  %s907_s24 = sand.u32 1, %s1575_s12  }
 0x1bc   : > { %p1937_p6 = scmp.ne.s32.totalorder %s1928_s25, 0  ;;  %s908_s29 = scalar_lea.sflag [#allocation4], %s907_s24 }
 0x1be   : > { %p1352_p11 = pnand %p1357_p4, %p1937_p6 }
 0x1c0   : > { %1570 = dma.done.wait (!%p1352_p11), %s908_s29, 2048  }
 0x1c1   : > { %1572 = vsyncadd (!%p1352_p11), %s908_s29, 4294965248  ;;  %p17_p13 = scmp.ge.s32.totalorder %s1643_s18, 5   ;;  %s1938_s12 = smov %s1579_s13 }
 0x1c2   : > { %s1939_s13 = smov %s1583_s14  ;;  %s1940_s14 = smov %s1655_s21 }
 0x1c3   : > { %s1941_s15 = smov %s1643_s18  ;;  %19 = sbr.rel (!%p17_p13) target bundleno = 6 (0x6), region = 81 }
 0x1ca   :  { %913 = vsyncpa [#allocation3], 1 }
 0x1cb   :  { %915 = vsyncpa [#allocation3 + $0x1], 1 }
 0x1cc   :  { %916 = vsyncpa [#allocation6], 1 }
 0x1cd   :  { %917 = vsyncpa [#allocation4], 1 }
 0x1ce   :  { %919 = vsyncpa [#allocation4 + $0x1], 1 }

</bundles_post_ra>
